<compile_context>
chip_gen: v5e
topology: v5e:2x2
jax: 0.10.0
libtpu: 0.0.40
codegen_flags: <defaults>
</compile_context>

<pallas_src>
import functools

import jax
import jax.numpy as jnp
from jax.experimental import pallas as pl
from jax.experimental.pallas import tpu as pltpu


def _round_up(n: int, m: int) -> int:
    return ((n + m - 1) // m) * m


# Conservative VMEM budget for picking the batch tile: fits comfortably under
# v7x's 64 MiB physical VMEM and well under v5e/v6e's 128 MiB.  The explicit
# vmem_limit_bytes lifts the small default scoped limits (16 MiB on v5e,
# 32 MiB on v6e/v7x) so large batch tiles are not silently rejected.
_VMEM_TILE_BUDGET = 40 * 1024 * 1024
_VMEM_LIMIT_BYTES = 48 * 1024 * 1024


def _combined_kernel(x_ref, w1_ref, b1_ref, w2_ref, b2_ref, o_ref):
    # x arrives straight from HBM in its native dtype (f32); cast to the bf16
    # compute dtype in-kernel (no wrapper-side pad/cast HBM pass).
    xb = x_ref[...].astype(w1_ref.dtype)
    # rna_model: Linear on the MXU with f32 accumulation, bias + ReLU in f32
    # on the VPU (v5e has no bf16 VPU path).  HID is padded to 128 lanes in
    # the wrapper, so h is lane-dense.
    h = jnp.dot(xb, w1_ref[...], preferred_element_type=jnp.float32)
    h = jnp.maximum(h + b1_ref[...], 0.0)
    # Explicit precision policy: feed the second MXU pass in the weight dtype
    # (bf16) while keeping f32 accumulation.
    h = h.astype(w2_ref.dtype)
    # adt_model: Linear.  N_CLS is left unpadded -> exact-shape store, no
    # padded class columns ever hit HBM and no post-kernel slice is needed.
    out = jnp.dot(h, w2_ref[...], preferred_element_type=jnp.float32)
    o_ref[...] = (out + b2_ref[...]).astype(o_ref.dtype)


@functools.partial(jax.jit, static_argnames=("tile_b_max", "compute_dtype"))
def combined_model_forward(x, w1, b1, w2, b2, *, tile_b_max=1024,
                           compute_dtype=jnp.bfloat16):
    """x: (B, D_IN); w1: (D_IN, HID); b1: (1, HID); w2: (HID, N_CLS); b2: (1, N_CLS)."""
    B, D_IN = x.shape
    HID, N_CLS = w2.shape

    # Lane-dense hidden layer: zero-pad HID to a multiple of 128 (weights are
    # tiny, so this costs nothing).  Padded h columns are exactly 0 (zero w1
    # cols, zero b1, ReLU) and multiply zero w2 rows, so the math is unchanged.
    hid_pad = _round_up(max(HID, 128), 128)
    w_item = jnp.dtype(compute_dtype).itemsize
    w1_p = jnp.pad(w1, ((0, 0), (0, hid_pad - HID))).astype(compute_dtype)
    b1_p = jnp.pad(b1, ((0, 0), (0, hid_pad - HID))).astype(jnp.float32)
    w2_p = jnp.pad(w2, ((0, hid_pad - HID), (0, 0))).astype(compute_dtype)
    b2_f = b2.astype(jnp.float32)

    # --- batch tile selection (all static Python math on shapes) -----------
    x_item = jnp.dtype(x.dtype).itemsize
    # Resident (grid-invariant) VMEM: weights + biases.
    resident = (D_IN * hid_pad + hid_pad * N_CLS) * w_item + (hid_pad + N_CLS) * 4
    # Streamed / per-row VMEM: double-buffered x and out tiles plus the f32 and
    # bf16 hidden intermediates and the f32 logits tile.
    per_row = 2 * D_IN * x_item + 2 * N_CLS * 4 + hid_pad * (4 + 2) + N_CLS * 4
    tile_fit = max(16, ((_VMEM_TILE_BUDGET - resident) // per_row) // 16 * 16)
    # Keep >= 4 grid steps when the batch allows it (>= 2 per TensorCore on
    # v7x's two cores); harmless on single-core v5e/v6e.
    tile_fair = max(16, _round_up(pl.cdiv(B, 4), 16))
    tile_b = min(tile_b_max, tile_fit, tile_fair)
    if tile_b >= B:
        tile_b = B  # a single full-extent block is always layout-legal
    grid = (pl.cdiv(B, tile_b),)  # batch remainder -> partial (masked) last block
    # TODO(synk): for very large D_IN (when tile_fit collapses), add a K grid
    # axis with an f32 hidden accumulator instead of shrinking the batch tile.

    cost = pl.CostEstimate(
        flops=2 * B * (D_IN * hid_pad + hid_pad * N_CLS),
        transcendentals=0,
        bytes_accessed=(B * D_IN * x_item          # x read (single pass, native dtype)
                        + B * N_CLS * 4            # exact-shape f32 logits write
                        + resident),               # weights/biases
    )

    return pl.pallas_call(
        _combined_kernel,
        out_shape=jax.ShapeDtypeStruct((B, N_CLS), jnp.float32),
        grid=grid,
        in_specs=[
            pl.BlockSpec((tile_b, D_IN), lambda i: (i, 0)),    # streamed x tiles
            pl.BlockSpec((D_IN, hid_pad), lambda i: (0, 0)),   # resident weights
            pl.BlockSpec((1, hid_pad), lambda i: (0, 0)),
            pl.BlockSpec((hid_pad, N_CLS), lambda i: (0, 0)),
            pl.BlockSpec((1, N_CLS), lambda i: (0, 0)),
        ],
        out_specs=pl.BlockSpec((tile_b, N_CLS), lambda i: (i, 0)),
        compiler_params=pltpu.CompilerParams(
            # Batch tiles are independent: shard across both TCs on v7x.
            dimension_semantics=("parallel",),
            vmem_limit_bytes=_VMEM_LIMIT_BYTES,
        ),
        cost_estimate=cost,
    )(x, w1_p, b1_p, w2_p, b2_f)


def reference_forward(x, w1, b1, w2, b2, compute_dtype=jnp.bfloat16):
    # Mirrors the kernel's precision policy (bf16 streams, f32 accumulation).
    xb = x.astype(compute_dtype)
    w1b = w1.astype(compute_dtype)
    w2b = w2.astype(compute_dtype)
    h = jnp.dot(xb, w1b, preferred_element_type=jnp.float32) + b1.astype(jnp.float32)
    h = jnp.maximum(h, 0.0).astype(compute_dtype)
    return jnp.dot(h, w2b, preferred_element_type=jnp.float32) + b2.astype(jnp.float32)


if __name__ == "__main__":
    key = jax.random.PRNGKey(0)
    B, D_IN, HID, N_CLS = 8, 32, 64, 16

    k_x, k_w1, k_b1, k_w2, k_b2 = jax.random.split(key, 5)
    x = jax.random.normal(k_x, (B, D_IN), dtype=jnp.float32)
    # Deterministic synthetic parameters (no checkpoint load).
    w1 = jax.random.normal(k_w1, (D_IN, HID), dtype=jnp.float32) * 0.05
    b1 = jax.random.normal(k_b1, (1, HID), dtype=jnp.float32) * 0.01
    w2 = jax.random.normal(k_w2, (HID, N_CLS), dtype=jnp.float32) * 0.05
    b2 = jax.random.normal(k_b2, (1, N_CLS), dtype=jnp.float32) * 0.01

    out = combined_model_forward(x, w1, b1, w2, b2)
    out = jax.block_until_ready(out)

    ref = reference_forward(x, w1, b1, w2, b2)
    assert out.shape == (B, N_CLS)
    assert jnp.allclose(out, ref, atol=2e-3, rtol=2e-3), "mismatch vs reference"

    print("KERNEL_OK")
</pallas_src>

<mosaic_0001>
module attributes {stable_mosaic.version = 11 : i64} {
  func.func @_combined_kernel(%arg0: i32, %arg1: memref<8x32xf32, #tpu.memory_space<vmem>>, %arg2: memref<32x128xbf16, #tpu.memory_space<vmem>>, %arg3: memref<1x128xf32, #tpu.memory_space<vmem>>, %arg4: memref<128x16xbf16, #tpu.memory_space<vmem>>, %arg5: memref<1x16xf32, #tpu.memory_space<vmem>>, %arg6: memref<8x16xf32, #tpu.memory_space<vmem>>) attributes {dimension_semantics = [#tpu.dimension_semantics<parallel>], iteration_bounds = array<i64: 1>, scalar_prefetch = 0 : i64, scratch_operands = 0 : i64, tpu.core_type = #tpu.core_type<tc>, window_params = [{transform_indices = @transform_0, window_bounds = array<i64: 8, 32>}, {pipeline_mode = #tpu.pipeline_mode<synchronous>, transform_indices = @transform_1, window_bounds = array<i64: 32, 128>}, {pipeline_mode = #tpu.pipeline_mode<synchronous>, transform_indices = @transform_2, window_bounds = array<i64: 1, 128>}, {pipeline_mode = #tpu.pipeline_mode<synchronous>, transform_indices = @transform_3, window_bounds = array<i64: 128, 16>}, {pipeline_mode = #tpu.pipeline_mode<synchronous>, transform_indices = @transform_4, window_bounds = array<i64: 1, 16>}, {transform_indices = @transform_5, window_bounds = array<i64: 8, 16>}]} {
    %c0 = arith.constant 0 : index
    %c0_0 = arith.constant 0 : index
    %0 = vector.load %arg1[%c0, %c0_0] : memref<8x32xf32, #tpu.memory_space<vmem>>, vector<8x32xf32>
    %1 = arith.truncf %0 : vector<8x32xf32> to vector<8x32xbf16>
    %c0_1 = arith.constant 0 : index
    %c0_2 = arith.constant 0 : index
    %2 = vector.load %arg2[%c0_1, %c0_2] : memref<32x128xbf16, #tpu.memory_space<vmem>>, vector<32x128xbf16>
    %cst = arith.constant dense<0.000000e+00> : vector<8x128xf32>
    %3 = tpu.matmul %1, %2, %cst {dimension_numbers = #tpu.dot_dimension_numbers<[1], [0], [0], [1], [0, 0, 1, 1], [], []>} : vector<8x32xbf16>, vector<32x128xbf16>, vector<8x128xf32> -> vector<8x128xf32>
    %c0_3 = arith.constant 0 : index
    %c0_4 = arith.constant 0 : index
    %4 = vector.load %arg3[%c0_3, %c0_4] : memref<1x128xf32, #tpu.memory_space<vmem>>, vector<1x128xf32>
    %5 = vector.broadcast %4 : vector<1x128xf32> to vector<8x128xf32>
    %6 = arith.addf %3, %5 : vector<8x128xf32>
    %cst_5 = arith.constant 0.000000e+00 : f32
    %7 = vector.broadcast %cst_5 : f32 to vector<8x128xf32>
    %8 = arith.maximumf %6, %7 : vector<8x128xf32>
    %9 = arith.truncf %8 : vector<8x128xf32> to vector<8x128xbf16>
    %c0_6 = arith.constant 0 : index
    %c0_7 = arith.constant 0 : index
    %10 = vector.load %arg4[%c0_6, %c0_7] : memref<128x16xbf16, #tpu.memory_space<vmem>>, vector<128x16xbf16>
    %cst_8 = arith.constant dense<0.000000e+00> : vector<8x16xf32>
    %11 = tpu.matmul %9, %10, %cst_8 {dimension_numbers = #tpu.dot_dimension_numbers<[1], [0], [0], [1], [0, 0, 1, 1], [], []>} : vector<8x128xbf16>, vector<128x16xbf16>, vector<8x16xf32> -> vector<8x16xf32>
    %c0_9 = arith.constant 0 : index
    %c0_10 = arith.constant 0 : index
    %12 = vector.load %arg5[%c0_9, %c0_10] : memref<1x16xf32, #tpu.memory_space<vmem>>, vector<1x16xf32>
    %13 = vector.broadcast %12 : vector<1x16xf32> to vector<8x16xf32>
    %14 = arith.addf %11, %13 : vector<8x16xf32>
    %c0_11 = arith.constant 0 : index
    %c0_12 = arith.constant 0 : index
    %15 = vector.load %arg6[%c0_11, %c0_12] : memref<8x16xf32, #tpu.memory_space<vmem>>, vector<8x16xf32>
    tpu.vector_store %arg6[%c0_11, %c0_12], %14 {strides = array<i32>} : memref<8x16xf32, #tpu.memory_space<vmem>>, vector<8x16xf32>,
    return
  }
  func.func @transform_0(%arg0: i32) -> (i32, i32) {
    %c0_i32 = arith.constant 0 : i32
    %c0_i32_0 = arith.constant 0 : i32
    return %arg0, %c0_i32 : i32, i32
  }
  func.func @transform_1(%arg0: i32) -> (i32, i32) {
    %c0_i32 = arith.constant 0 : i32
    %c0_i32_0 = arith.constant 0 : i32
    %c0_i32_1 = arith.constant 0 : i32
    return %c0_i32, %c0_i32_0 : i32, i32
  }
  func.func @transform_2(%arg0: i32) -> (i32, i32) {
    %c0_i32 = arith.constant 0 : i32
    %c0_i32_0 = arith.constant 0 : i32
    %c0_i32_1 = arith.constant 0 : i32
    return %c0_i32, %c0_i32_0 : i32, i32
  }
  func.func @transform_3(%arg0: i32) -> (i32, i32) {
    %c0_i32 = arith.constant 0 : i32
    %c0_i32_0 = arith.constant 0 : i32
    %c0_i32_1 = arith.constant 0 : i32
    return %c0_i32, %c0_i32_0 : i32, i32
  }
  func.func @transform_4(%arg0: i32) -> (i32, i32) {
    %c0_i32 = arith.constant 0 : i32
    %c0_i32_0 = arith.constant 0 : i32
    %c0_i32_1 = arith.constant 0 : i32
    return %c0_i32, %c0_i32_0 : i32, i32
  }
  func.func @transform_5(%arg0: i32) -> (i32, i32) {
    %c0_i32 = arith.constant 0 : i32
    %c0_i32_0 = arith.constant 0 : i32
    return %arg0, %c0_i32 : i32, i32
  }
}

</mosaic_0001>

<bundles_post_ra>
// kernel: combined_model_forward.1
= control target key start
LH: loop header
LB: loop body
LE: loop exit
PB: predicated region body
PF: predicated region fallthrough
CT: control target
= control target key end

     0   :  { %s315_s0 = inlined_call_operand.vmem [shape: f32[8,32], index: 0, kind: input, shape index: {}]   ;;  %s316_s1 = inlined_call_operand.vmem [shape: bf16[32,128], index: 1, kind: input, shape index: {}]   ;;  %s317_s2 = inlined_call_operand.vmem [shape: f32[1,128], index: 2, kind: input, shape index: {}]   ;;  %s318_s3 = inlined_call_operand.vmem [shape: bf16[128,16], index: 3, kind: input, shape index: {}]   ;;  %s319_s4 = inlined_call_operand.vmem [shape: f32[1,16], index: 4, kind: input, shape index: {}]   ;;  %s320_s5 = inlined_call_operand.hbm [shape: f32[8,16], index: 5, kind: output, shape index: {}]  }
   0x1   :  { %v204_v0 = vld [vmem:[%s316_s1 + $0x8] sm:$0xff]  ;;  %v212_v1 = vld [vmem:[%s318_s3 + $0x38] sm:$0xff]  ;;  %v203_v2 = vld [vmem:[%s316_s1] sm:$0xff] }
   0x2   :  { %54 = vmatpush.bf16.msra.mxu0 %v204_v0  ;;  %v22_v3 = vld [vmem:[%s315_s0] sm:$0xff]  ;;  %131 = vmatpush.bf16.msra.mxu1 %v212_v1  ;;  %v211_v4 = vld [vmem:[%s318_s3 + $0x30] sm:$0xff] }
   0x3   :  { %10 = vsyncpa [#allocation3], 0  ;;  %v23_v5 = vpack.c.bf16 %v22_v3, %v22_v3  ;;  %vm44_vm0 = vcmask 261120   ;;  %v210_v6 = vld [vmem:[%s318_s3 + $0x28] sm:$0xff]  ;;  %v209_v7 = vld [vmem:[%s318_s3 + $0x20] sm:$0xff]  ;;  %s242_s17 = smov [#allocation2]  }
   0x4   :  { %v208_v8 = vld [vmem:[%s318_s3 + $0x18] sm:$0xff]  ;;  %v207_v9 = vld [vmem:[%s318_s3 + $0x10] sm:$0xff]  ;;  %v206_v10 = vld [vmem:[%s318_s3 + $0x8] sm:$0xff]  ;;  %s151_s18 = sshll.u32 %s242_s17, 4  ;;  %vm144_vm1 = vcmask 130048   ;;  %s152_s18 = int_to_ptr.vmem [resolvable:$true] %s151_s18 }
   0x5   :  { %v205_v11 = vld [vmem:[%s318_s3] sm:$0xff]  ;;  %s153_s3 = sshll.u32 %s320_s5, 4  ;;  %s154_s3 = int_to_ptr.hbm [resolvable:$true] %s153_s3 }
   0x6   :  { %55 = vmatpush.bf16.msra.mxu0 %v203_v2  ;;  %132 = vmatpush.bf16.msra.mxu1 %v211_v4  ;;  %v214_v12 = vld [vmem:[%s317_s2] ss:$0 sm:$0xff] }
   0x7   :  { %v215_v18 = vld [vmem:[%s319_s4] ss:$0 sm:$0xff] }
   0x9   :  { %170 = vmatmul.msk.bf16.vlgmr.msra.gmra.mxu0 %vm44_vm0, %v23_v5 }
   0xa   :  { %133 = vmatpush.bf16.msra.mxu1 %v210_v6 }
   0xe   :  { %134 = vmatpush.bf16.msra.mxu1 %v209_v7 }
  0x12   :  { %135 = vmatpush.bf16.msra.mxu1 %v208_v8 }
  0x16   :  { %136 = vmatpush.bf16.msra.mxu1 %v207_v9 }
  0x1a   :  { %137 = vmatpush.bf16.msra.mxu1 %v206_v10 }
  0x1e   :  { %138 = vmatpush.bf16.msra.mxu1 %v205_v11 }
  0x86   :  { %v57_v13 = vpop.f32.mrf.mxu0 }
  0x87   :  { %v58_v14 = vadd.f32 %v214_v12, %v57_v13 }
  0x89   :  { %v61_v15 = vmax.f32 %v58_v14, 0.0 }
  0x8b   :  { %v62_v16 = vpack.c.bf16 %v61_v15, %v61_v15 }
  0x8d   :  { %139 = vmatmul.bf16.vlgmr.msra.gmra.mxu1 %v62_v16 }
  0x8e   :  { %v59_v17 = vpop.f32.mrf.mxu0 }
 0x10a   :  { %v140_v19 = vpop.f32.mrf.mxu1 }
 0x10b   :  { %v141_v20 = vadd.f32 %v215_v18, %v140_v19 }
 0x10d   :  { %145 = vst.msk [vmem:[#allocation2] sm:$0xff] %vm144_vm1, %v141_v20 }
 0x10e   :  { %156 = dma.vmem_to_hbm [thread:$0]  %s152_s18, 128, %s154_s3, [#allocation3]  }
 0x112   :  { %v142_v21 = vpop.f32.mrf.mxu1 }
 0x113   :  { %240 = dma.done.wait [#allocation3], 128  }
 0x114   :  { %241 = vsyncadd [#allocation3], 4294967168 }
 0x115   :  { %161 = vsyncpa [#allocation3], 1 }

</bundles_post_ra>
